<compile_context>
chip_gen: v7x
topology: tpu7x:2x2x1
jax: 0.10.0
libtpu: 0.0.40
codegen_flags: <defaults>
</compile_context>

<pallas_src>
import functools

import numpy as np
import jax
import jax.numpy as jnp
from jax.experimental import pallas as pl
from jax.experimental.pallas import tpu as pltpu


# ----------------------------------------------------------------------------
# Deterministic parameter construction (librosa slaney mel filterbank + hann window)
# ----------------------------------------------------------------------------
def _hz_to_mel(freqs):
    freqs = np.asarray(freqs, dtype=np.float64)
    f_sp = 200.0 / 3.0
    mels = freqs / f_sp
    min_log_hz = 1000.0
    min_log_mel = min_log_hz / f_sp
    logstep = np.log(6.4) / 27.0
    log_t = freqs >= min_log_hz
    mels = np.where(
        log_t, min_log_mel + np.log(np.maximum(freqs, 1e-10) / min_log_hz) / logstep, mels
    )
    return mels


def _mel_to_hz(mels):
    mels = np.asarray(mels, dtype=np.float64)
    f_sp = 200.0 / 3.0
    freqs = f_sp * mels
    min_log_hz = 1000.0
    min_log_mel = min_log_hz / f_sp
    logstep = np.log(6.4) / 27.0
    log_t = mels >= min_log_mel
    freqs = np.where(log_t, min_log_hz * np.exp(logstep * (mels - min_log_mel)), freqs)
    return freqs


def librosa_mel_fn(sr, n_fft, n_mels, fmin, fmax):
    """Slaney-normalized mel filterbank, matching librosa.filters.mel(norm='slaney')."""
    n_freq = n_fft // 2 + 1
    fftfreqs = np.linspace(0.0, sr / 2.0, n_freq)
    min_mel = _hz_to_mel(fmin)
    max_mel = _hz_to_mel(fmax)
    mel_f = _mel_to_hz(np.linspace(min_mel, max_mel, n_mels + 2))
    fdiff = np.diff(mel_f)
    ramps = mel_f[:, None] - fftfreqs[None, :]
    weights = np.zeros((n_mels, n_freq), dtype=np.float64)
    for i in range(n_mels):
        lower = -ramps[i] / fdiff[i]
        upper = ramps[i + 2] / fdiff[i + 1]
        weights[i] = np.maximum(0.0, np.minimum(lower, upper))
    enorm = 2.0 / (mel_f[2 : n_mels + 2] - mel_f[:n_mels])
    weights *= enorm[:, None]
    return weights.astype(np.float32)  # (n_mels, n_freq)


def _round_up(x, m):
    return ((x + m - 1) // m) * m


# ----------------------------------------------------------------------------
# Pallas kernel: shifted-chunk windowed DFT (bf16 MXU, f32 acc) -> magnitude -> mel matmul
# ----------------------------------------------------------------------------
def _mel_kernel(chunks_ref, cossin_ref, melT_ref, out_ref, *, f_pad, hop, r, tm):
    # chunks_ref: (NH, hop)        f32  -- hop-strided waveform chunks of one batch element
    # cossin_ref: (n_fft, 2*f_pad) bf16 -- windowed [cos | sin] DFT weights (trimmed+padded)
    # melT_ref  : (f_pad, M_pad)   bf16 -- transposed (trimmed, padded) mel filterbank
    # out_ref   : (tm, M_pad)      f32
    f0 = pl.multiple_of(pl.program_id(1) * tm, 8)      # first frame of this tile
    acc = None
    for j in range(r):                                  # frames[f] = concat_j chunks[f + j]
        blk = chunks_ref[pl.ds(f0 + j, tm), :].astype(jnp.bfloat16)      # (tm, hop)
        part = jnp.dot(blk, cossin_ref[j * hop:(j + 1) * hop, :],
                       preferred_element_type=jnp.float32)               # (tm, 2*f_pad)
        acc = part if acc is None else acc + part
    re = acc[:, :f_pad]                                 # 128-aligned slices
    im = acc[:, f_pad:]
    mag = jnp.sqrt(re * re + im * im + 1e-9)            # matches torch eps
    out_ref[...] = jnp.dot(mag.astype(jnp.bfloat16), melT_ref[...],
                           preferred_element_type=jnp.float32)


class MelSpectrogram:
    def __init__(self, sample_rate=22050, n_fft=1024, win_length=1024, hop_length=256,
                 n_mels=80, f_min=0.0, f_max=8000.0, norm="slaney", center=False):
        assert not center, "center=False (matches the reference module default)"
        assert win_length == n_fft
        assert norm == "slaney"
        assert n_fft % hop_length == 0, "shifted-chunk DFT needs hop | n_fft (true for defaults)"
        self.sample_rate = sample_rate
        self.n_fft = n_fft
        self.win_length = win_length
        self.hop_length = hop_length
        self.n_mels = n_mels
        self.f_min = f_min
        self.f_max = f_max
        self.pad_length = int((n_fft - hop_length) / 2)
        self.r = n_fft // hop_length

        n_freq = n_fft // 2 + 1
        self.n_freq = n_freq

        mel_basis = librosa_mel_fn(sample_rate, n_fft, n_mels, f_min, f_max)  # (n_mels, n_freq)

        # Trim to bins that carry nonzero mel weight (exact: zero-weight bins contribute 0).
        nz = np.nonzero(mel_basis.max(axis=0) > 0.0)[0]
        n_freq_used = int(nz[-1]) + 1 if nz.size else n_freq
        self.n_freq_used = n_freq_used
        self.F_pad = _round_up(n_freq_used, 128)
        self.M_pad = _round_up(n_mels, 128)

        # torch.hann_window(win_length) is periodic: w[n] = 0.5 - 0.5*cos(2*pi*n/N)
        window = 0.5 - 0.5 * np.cos(2.0 * np.pi * np.arange(win_length) / win_length)

        # Windowed one-sided DFT matrices (window folded in), trimmed to used bins.
        n = np.arange(n_fft)[:, None].astype(np.float64)
        k = np.arange(n_freq_used)[None, :].astype(np.float64)
        ang = 2.0 * np.pi * n * k / n_fft
        cos_w = (window[:, None] * np.cos(ang)).astype(np.float32)        # (n_fft, n_freq_used)
        sin_w = (window[:, None] * np.sin(ang)).astype(np.float32)        # (n_fft, n_freq_used)

        # Fused [cos | sin] RHS, zero-padded to lane-aligned width; mel basis transposed+padded.
        cossin = np.zeros((n_fft, 2 * self.F_pad), np.float32)
        cossin[:, :n_freq_used] = cos_w
        cossin[:, self.F_pad:self.F_pad + n_freq_used] = sin_w
        melT = np.zeros((self.F_pad, self.M_pad), np.float32)
        melT[:n_freq_used, :n_mels] = mel_basis[:, :n_freq_used].T

        # Device-resident weights (uploaded once), bf16 for the MXU matmuls.
        self.cossin_dev = jnp.asarray(cossin, dtype=jnp.bfloat16)
        self.melT_dev = jnp.asarray(melT, dtype=jnp.bfloat16)

        # One compiled program per input shape: pad + chunk reshape + pallas_call + transpose.
        self._jit_forward = jax.jit(self._forward)

    def _forward(self, x, cossin, melT):
        # x: (B, T) float32
        B, T = x.shape
        pad = self.pad_length
        hop, n_fft, r = self.hop_length, self.n_fft, self.r

        x_pad = jnp.pad(x, ((0, 0), (pad, pad)), mode="reflect")
        L = T + 2 * pad
        n_frames = 1 + (L - n_fft) // hop

        # Frame tiling: TM frames per grid step (8-aligned sublanes, amortizes step overhead).
        TM = min(256, _round_up(n_frames, 8))
        n_tiles = -(-n_frames // TM)
        rows_pad = n_tiles * TM
        # Chunk rows needed: any frame f in [0, rows_pad) reads chunk rows f .. f+r-1.
        NH = max(rows_pad + r - 1, -(-L // hop))
        x_pad = jnp.pad(x_pad, ((0, 0), (0, NH * hop - L)))
        chunks = x_pad.reshape(B, NH, hop)     # no data expansion: just hop-chunked waveform

        F_pad, M_pad = self.F_pad, self.M_pad
        out = pl.pallas_call(
            functools.partial(_mel_kernel, f_pad=F_pad, hop=hop, r=r, tm=TM),
            out_shape=jax.ShapeDtypeStruct((B, rows_pad, M_pad), jnp.float32),
            grid_spec=pltpu.PrefetchScalarGridSpec(
                num_scalar_prefetch=0,
                grid=(B, n_tiles),
                in_specs=[
                    pl.BlockSpec((None, NH, hop), lambda b, i: (b, 0, 0)),     # resident chunks
                    pl.BlockSpec((n_fft, 2 * F_pad), lambda b, i: (0, 0)),     # fused cos|sin
                    pl.BlockSpec((F_pad, M_pad), lambda b, i: (0, 0)),         # mel^T
                ],
                out_specs=pl.BlockSpec((None, TM, M_pad), lambda b, i: (b, i, 0)),
            ),
            compiler_params=pltpu.CompilerParams(
                dimension_semantics=("parallel", "parallel"),
                vmem_limit_bytes=48 * 1024 * 1024,
            ),
        )(chunks, cossin, melT)

        # (B, rows_pad, M_pad) -> (B, n_mels, n_frames), matching torch output layout.
        out = out[:, :n_frames, : self.n_mels]
        return jnp.transpose(out, (0, 2, 1))

    def __call__(self, x):
        return self._jit_forward(x, self.cossin_dev, self.melT_dev)


# ----------------------------------------------------------------------------
# Pure-JAX f32 reference (for a loose sanity check against the bf16 kernel)
# ----------------------------------------------------------------------------
def _reference_jax(x, mel):
    pad = mel.pad_length
    x_pad = jnp.pad(x, ((0, 0), (pad, pad)), mode="reflect")
    B, L = x_pad.shape
    n_frames = 1 + (L - mel.n_fft) // mel.hop_length
    idx = (jnp.arange(n_frames) * mel.hop_length)[:, None] + jnp.arange(mel.n_fft)[None, :]
    frames = x_pad[:, idx]                                                  # (B, F, n_fft)
    window = jnp.asarray(
        0.5 - 0.5 * np.cos(2.0 * np.pi * np.arange(mel.n_fft) / mel.n_fft), jnp.float32)
    fw = frames * window
    n_freq = mel.n_fft // 2 + 1
    n = np.arange(mel.n_fft)[:, None].astype(np.float64)
    k = np.arange(n_freq)[None, :].astype(np.float64)
    ang = 2.0 * np.pi * n * k / mel.n_fft
    cosm = jnp.asarray(np.cos(ang), jnp.float32)
    sinm = jnp.asarray(np.sin(ang), jnp.float32)
    re = jnp.einsum("bfn,nk->bfk", fw, cosm)
    im = jnp.einsum("bfn,nk->bfk", fw, sinm)
    mag = jnp.sqrt(re * re + im * im + 1e-9)
    melb = jnp.asarray(
        librosa_mel_fn(mel.sample_rate, mel.n_fft, mel.n_mels, mel.f_min, mel.f_max),
        jnp.float32)
    return jnp.einsum("mk,bfk->bmf", melb, mag)


if __name__ == "__main__":
    # Small, module-consistent configuration (constructor args are parameters).
    mel = MelSpectrogram(
        sample_rate=22050, n_fft=256, win_length=256, hop_length=64,
        n_mels=80, f_min=0.0, f_max=8000.0, norm="slaney", center=False,
    )

    key = jax.random.PRNGKey(0)
    B, T = 2, 512
    x = jax.random.normal(key, (B, T), dtype=jnp.float32)

    y = mel(x)
    jax.block_until_ready(y)

    # Sanity: expected shape (B, n_mels, n_frames)
    pad = mel.pad_length
    n_frames = 1 + (T + 2 * pad - mel.n_fft) // mel.hop_length
    assert y.shape == (B, mel.n_mels, n_frames), y.shape
    assert bool(jnp.all(jnp.isfinite(y)))

    # Loose accuracy check vs f32 reference (bf16 MXU tolerance).
    y_ref = _reference_jax(x, mel)
    err = float(jnp.max(jnp.abs(y - y_ref)))
    scale = float(jnp.max(jnp.abs(y_ref))) + 1e-6
    assert err / scale < 0.1, (err, scale)

    print("KERNEL_OK")
</pallas_src>

<mosaic_0001>
module attributes {stable_mosaic.version = 11 : i64} {
  func.func @_mel_kernel(%arg0: i32, %arg1: i32, %arg2: memref<1x11x64xf32, #tpu.memory_space<vmem>>, %arg3: memref<256x256xbf16, #tpu.memory_space<vmem>>, %arg4: memref<128x128xbf16, #tpu.memory_space<vmem>>, %arg5: memref<1x8x128xf32, #tpu.memory_space<vmem>>) attributes {dimension_semantics = [#tpu.dimension_semantics<parallel>, #tpu.dimension_semantics<parallel>], iteration_bounds = array<i64: 2, 1>, scalar_prefetch = 0 : i64, scratch_operands = 0 : i64, tpu.core_type = #tpu.core_type<tc>, window_params = [{transform_indices = @transform_0, window_bounds = array<i64: 1, 11, 64>}, {pipeline_mode = #tpu.pipeline_mode<synchronous>, transform_indices = @transform_1, window_bounds = array<i64: 256, 256>}, {pipeline_mode = #tpu.pipeline_mode<synchronous>, transform_indices = @transform_2, window_bounds = array<i64: 128, 128>}, {transform_indices = @transform_3, window_bounds = array<i64: 1, 8, 128>}]} {
    %c8_i32 = arith.constant 8 : i32
    %0 = arith.muli %arg1, %c8_i32 : i32
    %1 = tpu.assume_multiple %0, 8 : i32
    %c0_i32 = arith.constant 0 : i32
    %2 = arith.addi %1, %c0_i32 : i32
    %c0 = arith.constant 0 : index
    %3 = arith.index_cast %2 : i32 to index
    %c0_0 = arith.constant 0 : index
    %4 = vector.load %arg2[%c0, %3, %c0_0] : memref<1x11x64xf32, #tpu.memory_space<vmem>>, vector<1x8x64xf32>
    %5 = vector.shape_cast %4 : vector<1x8x64xf32> to vector<8x64xf32>
    %6 = arith.truncf %5 : vector<8x64xf32> to vector<8x64xbf16>
    %c0_1 = arith.constant 0 : index
    %c0_2 = arith.constant 0 : index
    %7 = vector.load %arg3[%c0_1, %c0_2] : memref<256x256xbf16, #tpu.memory_space<vmem>>, vector<64x256xbf16>
    %cst = arith.constant dense<0.000000e+00> : vector<8x256xf32>
    %8 = tpu.matmul %6, %7, %cst {dimension_numbers = #tpu.dot_dimension_numbers<[1], [0], [0], [1], [0, 0, 1, 1], [], []>} : vector<8x64xbf16>, vector<64x256xbf16>, vector<8x256xf32> -> vector<8x256xf32>
    %c1_i32 = arith.constant 1 : i32
    %9 = arith.addi %1, %c1_i32 : i32
    %c0_3 = arith.constant 0 : index
    %10 = arith.index_cast %9 : i32 to index
    %c0_4 = arith.constant 0 : index
    %11 = vector.load %arg2[%c0_3, %10, %c0_4] : memref<1x11x64xf32, #tpu.memory_space<vmem>>, vector<1x8x64xf32>
    %12 = vector.shape_cast %11 : vector<1x8x64xf32> to vector<8x64xf32>
    %13 = arith.truncf %12 : vector<8x64xf32> to vector<8x64xbf16>
    %c64 = arith.constant 64 : index
    %c0_5 = arith.constant 0 : index
    %14 = vector.load %arg3[%c64, %c0_5] : memref<256x256xbf16, #tpu.memory_space<vmem>>, vector<64x256xbf16>
    %cst_6 = arith.constant dense<0.000000e+00> : vector<8x256xf32>
    %15 = tpu.matmul %13, %14, %cst_6 {dimension_numbers = #tpu.dot_dimension_numbers<[1], [0], [0], [1], [0, 0, 1, 1], [], []>} : vector<8x64xbf16>, vector<64x256xbf16>, vector<8x256xf32> -> vector<8x256xf32>
    %16 = arith.addf %8, %15 : vector<8x256xf32>
    %c2_i32 = arith.constant 2 : i32
    %17 = arith.addi %1, %c2_i32 : i32
    %c0_7 = arith.constant 0 : index
    %18 = arith.index_cast %17 : i32 to index
    %c0_8 = arith.constant 0 : index
    %19 = vector.load %arg2[%c0_7, %18, %c0_8] : memref<1x11x64xf32, #tpu.memory_space<vmem>>, vector<1x8x64xf32>
    %20 = vector.shape_cast %19 : vector<1x8x64xf32> to vector<8x64xf32>
    %21 = arith.truncf %20 : vector<8x64xf32> to vector<8x64xbf16>
    %c128 = arith.constant 128 : index
    %c0_9 = arith.constant 0 : index
    %22 = vector.load %arg3[%c128, %c0_9] : memref<256x256xbf16, #tpu.memory_space<vmem>>, vector<64x256xbf16>
    %cst_10 = arith.constant dense<0.000000e+00> : vector<8x256xf32>
    %23 = tpu.matmul %21, %22, %cst_10 {dimension_numbers = #tpu.dot_dimension_numbers<[1], [0], [0], [1], [0, 0, 1, 1], [], []>} : vector<8x64xbf16>, vector<64x256xbf16>, vector<8x256xf32> -> vector<8x256xf32>
    %24 = arith.addf %16, %23 : vector<8x256xf32>
    %c3_i32 = arith.constant 3 : i32
    %25 = arith.addi %1, %c3_i32 : i32
    %c0_11 = arith.constant 0 : index
    %26 = arith.index_cast %25 : i32 to index
    %c0_12 = arith.constant 0 : index
    %27 = vector.load %arg2[%c0_11, %26, %c0_12] : memref<1x11x64xf32, #tpu.memory_space<vmem>>, vector<1x8x64xf32>
    %28 = vector.shape_cast %27 : vector<1x8x64xf32> to vector<8x64xf32>
    %29 = arith.truncf %28 : vector<8x64xf32> to vector<8x64xbf16>
    %c192 = arith.constant 192 : index
    %c0_13 = arith.constant 0 : index
    %30 = vector.load %arg3[%c192, %c0_13] : memref<256x256xbf16, #tpu.memory_space<vmem>>, vector<64x256xbf16>
    %cst_14 = arith.constant dense<0.000000e+00> : vector<8x256xf32>
    %31 = tpu.matmul %29, %30, %cst_14 {dimension_numbers = #tpu.dot_dimension_numbers<[1], [0], [0], [1], [0, 0, 1, 1], [], []>} : vector<8x64xbf16>, vector<64x256xbf16>, vector<8x256xf32> -> vector<8x256xf32>
    %32 = arith.addf %24, %31 : vector<8x256xf32>
    %33 = vector.extract_strided_slice %32 {offsets = [0, 0], sizes = [8, 128], strides = [1, 1]} : vector<8x256xf32> to vector<8x128xf32>
    %34 = vector.extract_strided_slice %32 {offsets = [0, 128], sizes = [8, 128], strides = [1, 1]} : vector<8x256xf32> to vector<8x128xf32>
    %35 = arith.mulf %33, %33 : vector<8x128xf32>
    %36 = arith.mulf %34, %34 : vector<8x128xf32>
    %37 = arith.addf %35, %36 : vector<8x128xf32>
    %cst_15 = arith.constant 9.99999971E-10 : f32
    %38 = vector.broadcast %cst_15 : f32 to vector<8x128xf32>
    %39 = arith.addf %37, %38 : vector<8x128xf32>
    %40 = math.sqrt %39 : vector<8x128xf32>
    %41 = arith.truncf %40 : vector<8x128xf32> to vector<8x128xbf16>
    %c0_16 = arith.constant 0 : index
    %c0_17 = arith.constant 0 : index
    %42 = vector.load %arg4[%c0_16, %c0_17] : memref<128x128xbf16, #tpu.memory_space<vmem>>, vector<128x128xbf16>
    %cst_18 = arith.constant dense<0.000000e+00> : vector<8x128xf32>
    %43 = tpu.matmul %41, %42, %cst_18 {dimension_numbers = #tpu.dot_dimension_numbers<[1], [0], [0], [1], [0, 0, 1, 1], [], []>} : vector<8x128xbf16>, vector<128x128xbf16>, vector<8x128xf32> -> vector<8x128xf32>
    %c0_19 = arith.constant 0 : index
    %c0_20 = arith.constant 0 : index
    %c0_21 = arith.constant 0 : index
    %44 = vector.load %arg5[%c0_19, %c0_20, %c0_21] : memref<1x8x128xf32, #tpu.memory_space<vmem>>, vector<1x8x128xf32>
    %45 = vector.shape_cast %44 : vector<1x8x128xf32> to vector<8x128xf32>
    %46 = vector.shape_cast %43 : vector<8x128xf32> to vector<1x8x128xf32>
    tpu.vector_store %arg5[%c0_19, %c0_20, %c0_21], %46 {strides = array<i32>} : memref<1x8x128xf32, #tpu.memory_space<vmem>>, vector<1x8x128xf32>,
    return
  }
  func.func @transform_0(%arg0: i32, %arg1: i32) -> (i32, i32, i32) {
    %c0_i32 = arith.constant 0 : i32
    %c0_i32_0 = arith.constant 0 : i32
    %c0_i32_1 = arith.constant 0 : i32
    return %arg0, %c0_i32, %c0_i32_0 : i32, i32, i32
  }
  func.func @transform_1(%arg0: i32, %arg1: i32) -> (i32, i32) {
    %c0_i32 = arith.constant 0 : i32
    %c0_i32_0 = arith.constant 0 : i32
    %c0_i32_1 = arith.constant 0 : i32
    return %c0_i32, %c0_i32_0 : i32, i32
  }
  func.func @transform_2(%arg0: i32, %arg1: i32) -> (i32, i32) {
    %c0_i32 = arith.constant 0 : i32
    %c0_i32_0 = arith.constant 0 : i32
    %c0_i32_1 = arith.constant 0 : i32
    return %c0_i32, %c0_i32_0 : i32, i32
  }
  func.func @transform_3(%arg0: i32, %arg1: i32) -> (i32, i32, i32) {
    %c0_i32 = arith.constant 0 : i32
    %c0_i32_0 = arith.constant 0 : i32
    return %arg0, %arg1, %c0_i32 : i32, i32, i32
  }
}

</mosaic_0001>

<bundles_post_ra>
// kernel: _forward.1
= control target key start
LH: loop header
LB: loop body
LE: loop exit
PB: predicated region body
PF: predicated region fallthrough
CT: control target
= control target key end

     0   :  { %8 = vsyncpa [#allocation3], 0  ;;  %s1085_s12 = smov 0   ;;  %s1087_s13 = smov 0   ;;  %s1203_s0 = inlined_call_operand.vmem [shape: f32[2,11,64], index: 0, kind: input, shape index: {}]   ;;  %s1204_s1 = inlined_call_operand.hbm [shape: bf16[256,256], index: 1, kind: input, shape index: {}]   ;;  %s1205_s2 = inlined_call_operand.vmem [shape: bf16[128,128], index: 2, kind: input, shape index: {}]   ;;  %s1206_s3 = inlined_call_operand.vmem [shape: f32[2,8,128], index: 3, kind: output, shape index: {}]  }
   0x1   :  { %s1089_s14 = smov 0  }
   0x2 LB: > { %s806_s15 = sadd.s32 4294967295, %s1057_s14   ;;  %s26_s16 = sadd.s32 1, %s1053_s13  ;;  %s1057_s14 = sphi %s1089_s14, %s14_s14   ;;  %s1053_s13 = sphi %s1087_s13, %s1216_s13   ;;  %s1049_s12 = sphi %s1085_s12, %s1215_s12  }
   0x3   : > { %p28_p0 = scmp.ge.s32.totalorder %s26_s16, 2  ;;  %p808_p1 = scmp.ge.s32.totalorder %s1057_s14, 1 }
   0x4   : > { %p127_p2 = scmp.lt.s32.totalorder %s1057_s14, 3  ;;  %p1110_p4 = scmp.eq.s32.totalorder %s806_s15, 0 }
   0x5   : > { %s1218_s16 = smov (%p28_p0, %s26_s16), 0  ;;  %s1059_s19 = smov [#allocation2]  }
   0x6   : > { %p1106_p3 = pnand %p808_p1, %p127_p2  ;;  %s139_s20 = sshll.u32 %s1059_s19, 4  ;;  %s140_s20 = int_to_ptr.vmem [resolvable:$true] %s139_s20 }
   0x7   : > { %s1211_s18 = scalar_select %p1110_p4, 1, 0 }
   0x8   : > { %s1210_s17 = scalar_select %p1106_p3, 1, 0 }
   0x9   : > { %p909_p5 = pneg %p1106_p3  ;;  %s1003_s24 = scalar_lea.hbm %s1204_s1, 4096 }
   0xa   : > { %p1004_p7 = scmp.ne.s32.totalorder %s1204_s1, %s1003_s24  ;;  %p1010_p11 = scmp.lt.u32.totalorder %s1003_s24, %s1204_s1 }
   0xb   : > { %p1118_p6 = pnand %p1110_p4, %p909_p5 }
   0xd   : > { %p1005_p8 = pneg %p1118_p6 }
   0xf   : > { %p1006_p9 = pnand %p1005_p8, %p1004_p7 }
  0x11   : > { %p1007_p10 = pneg %p1006_p9 }
  0x13   : > { %p1012_p12 = pnand %p1010_p11, %p1007_p10 }
  0x15   : > { %1015 = shalt.err (!%p1012_p12)
}
  0x16   : > { %s1016_s29 = scalar_lea.vmem %s140_s20, 4096  ;;  %p1024_p2 = scmp.lt.s32.totalorder %s140_s20, %s140_s20 }
  0x17   : > { %p1017_p13 = scmp.ne.s32.totalorder %s140_s20, %s1016_s29  ;;  %p1025_p5 = scmp.lt.s32.totalorder %s1016_s29, %s1016_s29 }
  0x19   : > { %p1019_p0 = pnand %p1017_p13, %p1005_p8  ;;  %p1026_p4 = por %p1025_p5, %p1024_p2 }
  0x1b   : > { %p1020_p1 = pneg %p1019_p0 }
  0x1d   : > { %p1027_p3 = pnand %p1026_p4, %p1020_p1 }
  0x1f   : > { %1030 = shalt.err (!%p1027_p3)
}
  0x20   : > { %s1060_s30 = smov 128   ;;  %s1061_s4 = smov 8  }
  0x21   : > { %912 = dma.hbm_to_vmem [thread:$0]  (!%p1118_p6), %s1204_s1, 4096, %s140_s20, [#allocation3], %s1060_s30, %s1060_s30, %s1061_s4  }
  0x22   : > { %p1213_p7 = scmp.ne.s32.totalorder %s1210_s17, 0 }
  0x23   : > { %p1214_p9 = scmp.ne.s32.totalorder (!%p1213_p7), %s1211_s18, 0 }
  0x24   : > { %166 = sbr.rel (%p1213_p7) target bundleno = 547 (0x223), region = 32 }
  0x2b   : > { %1044 = dma.done.wait (%p1214_p9), [#allocation3], 4096  }
  0x2c   : > { %1046 = vsyncadd (%p1214_p9), [#allocation3], 4294963200  ;;  %v1062_v0 = vmov 0   ;;  %p192_p3 = scmp.lt.s32.totalorder %s1049_s12, 1  ;;  %v945_v1 = vld [vmem:[#allocation2 + $0x4] ss:$8 sps:$4 sm:$0xff]  }
  0x2d   : > { %389 = vmatprep.mubr.bf16.mxu0 %v1062_v0  ;;  %305 = vmatprep.mubr.bf16.mxu1 %v1062_v0  ;;  %v947_v2 = vld [vmem:[#allocation2] ss:$8 sps:$4 sm:$0xff]   ;;  %v948_v3 = vld [vmem:[#allocation2 + $0x14] ss:$8 sps:$4 sm:$0xff]   ;;  %v950_v4 = vld [vmem:[#allocation2 + $0x10] ss:$8 sps:$4 sm:$0xff]  }
  0x2e   : > { %s1220_s12 = smov (!%p192_p3, %s1049_s12), 1  ;;  %357 = vmatprep.subr.bf16.mxu0 %v945_v1  ;;  %v951_v5 = vld [vmem:[#allocation2 + $0x24] ss:$8 sps:$4 sm:$0xff]   ;;  %v953_v6 = vld [vmem:[#allocation2 + $0x20] ss:$8 sps:$4 sm:$0xff]   ;;  %vm269_vm0 = vcmask 523264  }
  0x2f   : > { %358 = vmatpush1.bf16.msra.mxu0 %v947_v2  ;;  %s865_s7 = sshll.u32 %s1220_s12, 4  ;;  %v954_v7 = vld [vmem:[#allocation2 + $0x34] ss:$8 sps:$4 sm:$0xff]   ;;  %v956_v8 = vld [vmem:[#allocation2 + $0x30] ss:$8 sps:$4 sm:$0xff]   ;;  %v993_v27 = vld [vmem:[%s1205_s2] sm:$0xff]  }
  0x30   : > { %359 = vmatprep.subr.bf16.mxu0 %v948_v3  ;;  %s1154_s10 = scalar_lea.vmem %s1203_s0, %s865_s7  ;;  %v959_v9 = vld [vmem:[#allocation2 + $0x84] ss:$8 sps:$4 sm:$0xff]   ;;  %v971_v12 = vld [vmem:[#allocation2 + $0x40] ss:$8 sps:$4 sm:$0xff]   ;;  %v975_v15 = vld [vmem:[#allocation2 + $0x54] ss:$8 sps:$4 sm:$0xff]  }
  0x31   : > { %v207_v10 = vld [vmem:[%s1154_s10] sm:$0xff]  ;;  %v977_v16 = vld [vmem:[#allocation2 + $0x50] ss:$8 sps:$4 sm:$0xff]   ;;  %v962_v17 = vld [vmem:[#allocation2 + $0x94] ss:$8 sps:$4 sm:$0xff]   ;;  %v1063_v31 = vmov 0.0  }
  0x32   : > { %v969_v11 = vld [vmem:[#allocation2 + $0x44] ss:$8 sps:$4 sm:$0xff]   ;;  %v957_v13 = vld [vmem:[#allocation2 + $0x80] ss:$8 sps:$4 sm:$0xff]   ;;  %v208_v14 = vpack.c.bf16 %v207_v10, %v207_v10  ;;  %v960_v20 = vld [vmem:[#allocation2 + $0x90] ss:$8 sps:$4 sm:$0xff]  }
  0x33   : > { %360 = vmatpush1.bf16.msra.mxu0 %v950_v4  ;;  %273 = vmatprep.subr.bf16.mxu1 %v969_v11  ;;  %v981_v18 = vld [vmem:[#allocation2 + $0x64] ss:$8 sps:$4 sm:$0xff]   ;;  %v983_v19 = vld [vmem:[#allocation2 + $0x60] ss:$8 sps:$4 sm:$0xff]   ;;  %v987_v22 = vld [vmem:[#allocation2 + $0x74] ss:$8 sps:$4 sm:$0xff]  }
  0x34   : > { %361 = vmatprep.subr.bf16.mxu0 %v951_v5  ;;  %274 = vmatpush1.bf16.msra.mxu1 %v971_v12  ;;  %v965_v21 = vld [vmem:[#allocation2 + $0xa4] ss:$8 sps:$4 sm:$0xff]   ;;  %v963_v23 = vld [vmem:[#allocation2 + $0xa0] ss:$8 sps:$4 sm:$0xff]   ;;  %v989_v24 = vld [vmem:[#allocation2 + $0x70] ss:$8 sps:$4 sm:$0xff]  }
  0x35   : > { %275 = vmatprep.subr.bf16.mxu1 %v975_v15  ;;  %v816_v25 = vld [vmem:[%s1154_s10 + $0x1] sm:$0xff]  ;;  %v968_v26 = vld [vmem:[#allocation2 + $0xb4] ss:$8 sps:$4 sm:$0xff]   ;;  %v966_v28 = vld [vmem:[#allocation2 + $0xb0] ss:$8 sps:$4 sm:$0xff]   ;;  %vm1064_vm1 = vmmov 0  }
  0x36   : > { %v835_v29 = vld [vmem:[%s1154_s10 + $0x2] sm:$0xff]  ;;  %v220_v30 = vpack.c.bf16 %v816_v25, %v816_v25  ;;  %v980_v35 = vld [vmem:[#allocation2 + $0xd4] ss:$8 sps:$4 sm:$0xff]   ;;  %v978_v36 = vld [vmem:[#allocation2 + $0xd0] ss:$8 sps:$4 sm:$0xff]   ;;  %s815_s4 = sshll.u32 %s1220_s12, 3 }
  0x37   : > { %362 = vmatpush1.bf16.msra.mxu0 %v953_v6  ;;  %v974_v32 = vld [vmem:[#allocation2 + $0xc4] ss:$8 sps:$4 sm:$0xff]   ;;  %v401_v33 = vpack.c.bf16 %v835_v29, %v835_v29  ;;  %v972_v34 = vld [vmem:[#allocation2 + $0xc0] ss:$8 sps:$4 sm:$0xff]   ;;  %v992_v39 = vld [vmem:[#allocation2 + $0xf4] ss:$8 sps:$4 sm:$0xff]   ;;  %s203_s7 = scalar_lea.vmem %s1206_s3, %s815_s4 }
  0x38   : > { %363 = vmatprep.subr.bf16.mxu0 %v954_v7  ;;  %276 = vmatpush1.bf16.msra.mxu1 %v977_v16  ;;  %v986_v37 = vld [vmem:[#allocation2 + $0xe4] ss:$8 sps:$4 sm:$0xff]   ;;  %v984_v38 = vld [vmem:[#allocation2 + $0xe0] ss:$8 sps:$4 sm:$0xff]   ;;  %v990_v40 = vld [vmem:[#allocation2 + $0xf0] ss:$8 sps:$4 sm:$0xff]  }
  0x39   : > { %277 = vmatprep.subr.bf16.mxu1 %v981_v18  ;;  %v845_v41 = vld [vmem:[%s1154_s10 + $0x3] sm:$0xff]  ;;  %v995_v44 = vld [vmem:[%s1205_s2 + $0x10] sm:$0xff]   ;;  %v996_v45 = vld [vmem:[%s1205_s2 + $0x18] sm:$0xff]  }
  0x3a   : > { %v499_v42 = vpack.c.bf16 %v845_v41, %v845_v41  ;;  %v994_v43 = vld [vmem:[%s1205_s2 + $0x8] sm:$0xff]   ;;  %v997_v46 = vld [vmem:[%s1205_s2 + $0x20] sm:$0xff]   ;;  %v999_v48 = vld [vmem:[%s1205_s2 + $0x30] sm:$0xff]  }
  0x3b   : > { %364 = vmatpush1.bf16.msra.mxu0 %v956_v8  ;;  %v998_v47 = vld [vmem:[%s1205_s2 + $0x28] sm:$0xff]   ;;  %v1000_v49 = vld [vmem:[%s1205_s2 + $0x38] sm:$0xff]  }
  0x3c   : > { %453 = vmatprep.subr.bf16.mxu0 %v959_v9  ;;  %278 = vmatpush1.bf16.msra.mxu1 %v983_v19 }
  0x3d   : > { %279 = vmatprep.subr.bf16.mxu1 %v987_v22 }
  0x3e   : > { %834 = vmatmul.mubr.msk.bf16.vlgmr.msra.gmra.mrb[0].mxu0 %vm269_vm0, %v208_v14 }
  0x3f   : > { %454 = vmatpush1.bf16.msra.mxu0 %v957_v13  ;;  %485 = vmatprep.mubr.bf16.mxu0 %v1062_v0 }
  0x40   : > { %455 = vmatprep.subr.bf16.mxu0 %v962_v17  ;;  %280 = vmatpush1.bf16.msra.mxu1 %v989_v24 }
  0x41   : > { %875 = vmatprep.subr.bf16.mxu1 %v1063_v31 }
  0x43   : > { %456 = vmatpush1.bf16.msra.mxu0 %v960_v20  ;;  %825 = vmatmul.mubr.msk.bf16.vlgmr.msra.gmra.mrb[0].mxu1 %vm269_vm0, %v220_v30 }
  0x44   : > { %457 = vmatprep.subr.bf16.mxu0 %v965_v21  ;;  %876 = vmatpush3.bf16.msra.mxu1 %v993_v27 }
  0x45   : > { %877 = vmatprep.subr.bf16.mxu1 %v1063_v31  ;;  %891 = vmatprep.mubr.msk.bf16.mxu1 %vm1064_vm1, %v1063_v31 }
  0x47   : > { %458 = vmatpush1.bf16.msra.mxu0 %v963_v23 }
  0x48   : > { %459 = vmatprep.subr.bf16.mxu0 %v968_v26  ;;  %878 = vmatpush3.bf16.msra.mxu1 %v994_v43 }
  0x49   : > { %879 = vmatprep.subr.bf16.mxu1 %v1063_v31 }
  0x4b   : > { %460 = vmatpush1.bf16.msra.mxu0 %v966_v28 }
  0x4c   : > { %551 = vmatprep.subr.bf16.mxu0 %v974_v32  ;;  %880 = vmatpush3.bf16.msra.mxu1 %v995_v44 }
  0x4d   : > { %881 = vmatprep.subr.bf16.mxu1 %v1063_v31 }
  0x4e   : > { %844 = vmatmul.mubr.msk.bf16.vlgmr.msra.gmra.mrb[0].mxu0 %vm269_vm0, %v401_v33 }
  0x4f   : > { %552 = vmatpush1.bf16.msra.mxu0 %v972_v34  ;;  %583 = vmatprep.mubr.bf16.mxu0 %v1062_v0 }
  0x50   : > { %553 = vmatprep.subr.bf16.mxu0 %v980_v35  ;;  %882 = vmatpush3.bf16.msra.mxu1 %v996_v45 }
  0x51   : > { %883 = vmatprep.subr.bf16.mxu1 %v1063_v31 }
  0x53   : > { %554 = vmatpush1.bf16.msra.mxu0 %v978_v36 }
  0x54   : > { %555 = vmatprep.subr.bf16.mxu0 %v986_v37  ;;  %884 = vmatpush3.bf16.msra.mxu1 %v997_v46 }
  0x55   : > { %885 = vmatprep.subr.bf16.mxu1 %v1063_v31 }
  0x57   : > { %556 = vmatpush1.bf16.msra.mxu0 %v984_v38 }
  0x58   : > { %557 = vmatprep.subr.bf16.mxu0 %v992_v39  ;;  %886 = vmatpush3.bf16.msra.mxu1 %v998_v47 }
  0x59   : > { %887 = vmatprep.subr.bf16.mxu1 %v1063_v31 }
  0x5b   : > { %558 = vmatpush1.bf16.msra.mxu0 %v990_v40 }
  0x5c   : > { %888 = vmatpush3.bf16.msra.mxu1 %v999_v48 }
  0x5d   : > { %889 = vmatprep.subr.bf16.mxu1 %v1063_v31 }
  0x5e   : > { %854 = vmatmul.mubr.msk.bf16.vlgmr.msra.gmra.mrb[0].mxu0 %vm269_vm0, %v499_v42 }
  0x60   : > { %890 = vmatpush3.bf16.msra.mxu1 %v1000_v49 }
 0x116   : > { %v307_v50 = vpop.f32.mrb[0].mxu1 }
 0x117   : > { %v309_v51 = vpop.f32.mrb[1].mxu1 }
 0x118   : > { %v311_v52 = vpop.f32.mrb[2].mxu1 }
 0x119   : > { %v312_v53 = vpop.f32.mrb[3].mxu1 }
 0x131   : > { %v585_v54 = vpop.f32.mrb[0].mxu0 }
 0x132   : > { %v895_v55 = vadd.f32 %v585_v54, %v307_v50  ;;  %v587_v56 = vpop.f32.mrb[1].mxu0 }
 0x133   : > { %v896_v57 = vadd.f32 %v587_v56, %v309_v51  ;;  %v589_v58 = vpop.f32.mrb[2].mxu0 }
 0x134   : > { %v594_v59 = vmul.f32 %v895_v55, %v895_v55  ;;  %v590_v60 = vpop.f32.mrb[3].mxu0 }
 0x135   : > { %v595_v61 = vmul.f32 %v896_v57, %v896_v57 }
 0x137   : > { %v596_v62 = vadd.f32 %v595_v61, %v594_v59 }
 0x139   : > { %v597_v63 = vadd.f32 1e-09, %v596_v62 }
 0x13b   : > { %1001 = vrsqrt.f32 %v597_v63  ;;  %vm600_vm2 = vcmp.eq.f32.partialorder %v597_v63, inf  ;;  %v603_v2 = vand.u32 2147483648, %v597_v63  ;;  %vm602_vm3 = vcmp.eq.f32.partialorder %v597_v63, 0.0 }
 0x145   : > { %v1002_v0 = vpop.eup %1001 }
 0x146   : > { %v599_v1 = vmul.f32 %v1002_v0, %v597_v63 }
 0x148   : > { %v601_v3 = vsel %vm600_vm2, %v597_v63, %v599_v1 }
 0x149   : > { %v604_v4 = vsel %vm602_vm3, %v603_v2, %v601_v3 }
 0x14a   : > { %v605_v5 = vpack.c.bf16 %v604_v4, %v604_v4 }
 0x14c   : > { %892 = vmatmul.mubr.bf16.vlgmr.msra.gmra.mrb[4].mxu1 %v605_v5 }
 0x21f   : > { %v704_v6 = vpop.f32.mrb[4].mxu1 }
 0x220   : > { %710 = vst [vmem:[%s203_s7] sm:$0xff] %v704_v6  ;;  %v893_v7 = vpop.f32.mrb[5].mxu1 }
 0x221   : > { %v707_v8 = vpop.f32.mrb[6].mxu1 }
 0x222   : > { %v894_v9 = vpop.f32.mrb[7].mxu1 }
 0x223 PF: > { %s14_s14 = sadd.s32 1, %s1057_s14   ;;  %s1215_s12 = smov %s1053_s13 }
 0x224   : > { %p11_p4 = scmp.ge.s32.totalorder %s14_s14, 4   ;;  %s1216_s13 = smov %s1218_s16 }
 0x226   :  { %13 = sbr.rel (!%p11_p4) target bundleno = 2 (0x2), region = 71 }
 0x22d   :  { %736 = vsyncpa [#allocation3], 1 }
 0x22e   :  { %738 = vsyncpa [#allocation3 + $0x1], 1 }

</bundles_post_ra>
